<compile_context>
chip_gen: v5e
topology: v5e:2x2
jax: 0.10.0
libtpu: 0.0.40
codegen_flags: <defaults>
</compile_context>

<pallas_src>
import numpy as np
import jax
import jax.numpy as jnp
from jax.experimental import pallas as pl
from jax.experimental.pallas import tpu as pltpu


def _softplus(x):
    # numerically-stable softplus (matches torch.nn.Softplus to fp32 precision)
    return jnp.maximum(x, 0.0) + jnp.log1p(jnp.exp(-jnp.abs(x)))


def _round_up(n, m):
    return ((n + m - 1) // m) * m


def _make_kernel(n_holes, channels, positive_outs, layer_dims, offsets):
    """Build the fused kernel.  All structural info is static (closed over)."""
    off_in_s, off_in_b, off_out_s, off_out_b, layer_offs = offsets

    def kernel(x_ref, hid_ref, par_ref, out_ref):
        x = x_ref[...]                                # (1, TM) f32, rows on lanes
        hid = hid_ref[...]                            # (1, TM) i32 per-row hole id
        masks = [hid == i for i in range(n_holes)]    # reused below

        # ---- holes_in: h = x * softplus(in_slope[hole]) + in_bias[hole]
        # (slopes were softplus-activated in the wrapper; select per hole.)
        slope = jnp.zeros_like(x)
        bias = jnp.zeros_like(x)
        for i in range(n_holes):
            slope = jnp.where(masks[i], par_ref[off_in_s + i], slope)
            bias = jnp.where(masks[i], par_ref[off_in_b + i], bias)
        h = x * slope + bias                          # (1, TM)

        # ---- LatentF: unrolled VPU broadcast-FMA over tiny feature dims.
        for li, (d_in, d_out) in enumerate(layer_dims):
            owl, obl, ownl, obnl = layer_offs[li]
            # linear branch (broadcast over output channels)
            lin = h[0:1, :] * par_ref[owl + 0]
            for k in range(1, d_in):
                lin = lin + h[k:k + 1, :] * par_ref[owl + k]
            lin = lin + par_ref[obl]
            # non-linear branch, one output row per channel
            rows = []
            for c in range(d_out):
                acc = h[0:1, :] * par_ref[ownl + 0 * d_out + c]
                for k in range(1, d_in):
                    acc = acc + h[k:k + 1, :] * par_ref[ownl + k * d_out + c]
                acc = acc + par_ref[obnl + c]
                rows.append(lin + _softplus(acc))
            h = jnp.concatenate(rows, axis=0)         # (d_out, TM)

        # ---- holes_out: o[c,:] = h[c,:] * slope_out[hole,c] + bias_out[hole,c]
        # positive_outs handled statically (softplus only on the flagged channel)
        out_rows = []
        for c in range(channels):
            s_c = jnp.zeros_like(x)
            b_c = jnp.zeros_like(x)
            for i in range(n_holes):
                s_c = jnp.where(masks[i], par_ref[off_out_s + i * channels + c], s_c)
                b_c = jnp.where(masks[i], par_ref[off_out_b + i * channels + c], b_c)
            o_c = h[c:c + 1, :] * s_c + b_c
            if positive_outs[c]:
                o_c = _softplus(o_c)
            out_rows.append(o_c)
        out_ref[...] = jnp.concatenate(out_rows, axis=0)   # (C, TM)

    return kernel


def watercan_forward(xs_list, params, tm=512):
    """xs_list: list of (n_i, 1) float32 arrays. Returns list of (n_i, 2)."""
    split_sizes = [int(x.shape[0]) for x in xs_list]
    n_holes = len(xs_list)
    C = int(params["out_slope"].shape[1])
    positive_outs = tuple(bool(v) for v in (np.asarray(params["positive_outs"]) > 0.5))
    out_monot = np.asarray(params.get("out_monot", np.ones((C,), dtype=bool)))

    # ---- pre-activate per-hole slopes on the host/XLA side (tiny, n_holes*C)
    in_slope_act = _softplus(jnp.asarray(params["in_slope"], jnp.float32))        # (H,)
    out_sp = _softplus(jnp.asarray(params["out_slope"], jnp.float32))             # (H,C)
    out_slope_act = jnp.where(jnp.asarray(out_monot)[None, :], out_sp, -out_sp)   # (H,C)

    # ---- pack every tiny parameter into a single flat f32 array (SMEM-resident)
    flat = [in_slope_act.reshape(-1),
            jnp.asarray(params["in_bias"], jnp.float32).reshape(-1),
            out_slope_act.reshape(-1),
            jnp.asarray(params["out_bias"], jnp.float32).reshape(-1)]
    off_in_s = 0
    off_in_b = n_holes
    off_out_s = 2 * n_holes
    off_out_b = 2 * n_holes + n_holes * C
    pos = 2 * n_holes + 2 * n_holes * C
    layer_offs, layer_dims = [], []
    for (wnl, bnl, wl, bl) in params["layers"]:
        d_in, d_out = int(wnl.shape[0]), int(wnl.shape[1])
        owl = pos; pos += d_in            # wl  flattened (d_in,)
        obl = pos; pos += 1               # bl  (1,)
        ownl = pos; pos += d_in * d_out   # wnl flattened row-major [k, c]
        obnl = pos; pos += d_out          # bnl (d_out,)
        flat += [jnp.asarray(wl, jnp.float32).reshape(-1),
                 jnp.asarray(bl, jnp.float32).reshape(-1),
                 jnp.asarray(wnl, jnp.float32).reshape(-1),
                 jnp.asarray(bnl, jnp.float32).reshape(-1)]
        layer_offs.append((owl, obl, ownl, obnl))
        layer_dims.append((d_in, d_out))
    par = jnp.concatenate(flat)
    offsets = (off_in_s, off_in_b, off_out_s, off_out_b, tuple(layer_offs))

    # ---- lane-dense row layout: rows -> lane axis
    x_full = jnp.concatenate(xs_list, axis=0).astype(jnp.float32).reshape(-1)   # (N,)
    N = int(x_full.shape[0])
    hole_ids = np.concatenate(
        [np.full((n,), i, dtype=np.int32) for i, n in enumerate(split_sizes)])

    TM = max(128, min(int(tm), _round_up(N, 128)))   # lane tile, multiple of 128
    Np = _round_up(N, TM)
    pad = Np - N
    x_p = jnp.pad(x_full, (0, pad)).reshape(1, Np)
    hid_p = jnp.pad(jnp.asarray(hole_ids), (0, pad),
                    constant_values=-1).reshape(1, Np)          # -1 -> no hole match

    grid = (Np // TM,)
    row_spec = lambda r: pl.BlockSpec((r, TM), lambda i: (0, i))

    out = pl.pallas_call(
        _make_kernel(n_holes, C, positive_outs, tuple(layer_dims), offsets),
        out_shape=jax.ShapeDtypeStruct((C, Np), jnp.float32),
        grid=grid,
        in_specs=[row_spec(1),                                           # x
                  row_spec(1),                                           # hole_id
                  pl.BlockSpec(memory_space=pltpu.MemorySpace.SMEM)],    # packed params
        out_specs=row_spec(C),
        compiler_params=pltpu.CompilerParams(
            dimension_semantics=("parallel",)),   # shards grid steps across TCs on v7x
    )(x_p, hid_p, par)

    # back to [rows, channels] + per-hole split (cheap XLA glue)
    out_rows = out[:, :N].T                                            # (N, C)
    offs = np.cumsum([0] + split_sizes)
    return [out_rows[offs[i]:offs[i + 1]] for i in range(n_holes)]


def watercan_reference(xs_list, params):
    """Pure-JAX reference mirroring the PyTorch forward."""
    sp = _softplus
    C = int(params["out_slope"].shape[1])
    hs = [x * sp(params["in_slope"][i]) + params["in_bias"][i]
          for i, x in enumerate(xs_list)]
    h = jnp.concatenate(hs, axis=0)
    for (wnl, bnl, wl, bl) in params["layers"]:
        nl = sp(h @ wnl + bnl)
        lin = h @ wl + bl
        h = lin + nl
    sizes = [x.shape[0] for x in xs_list]
    offs = np.cumsum([0] + sizes)
    pos = jnp.asarray(params["positive_outs"]) > 0.5
    out_monot = jnp.asarray(params.get("out_monot", np.ones((C,), dtype=bool)))
    out_slopes = jnp.where(out_monot[None, :], sp(params["out_slope"]),
                           -sp(params["out_slope"]))
    outs = []
    for i in range(len(xs_list)):
        seg = h[offs[i]:offs[i + 1]]
        o = seg * out_slopes[i] + params["out_bias"][i]
        outs.append(jnp.where(pos, sp(o), o))
    return outs


if __name__ == "__main__":
    # WaterCan(hidden_sizes=[8], channels_out=2, n_holes=2, monot='+', isolate_outs=True)
    hidden_sizes = [8]
    C = 2
    n_holes = 2
    rows_per_hole = [8, 8]

    key = jax.random.PRNGKey(0)
    keys = jax.random.split(key, 16)
    ki = 0

    # LatentF parameters (weights stored transposed: (in, out))
    dims = [1] + hidden_sizes + [C]
    layers = []
    for i in range(1, len(dims)):
        wnl = 0.5 * jax.random.normal(keys[ki], (dims[i - 1], dims[i]), jnp.float32); ki += 1
        bnl = 0.5 * jax.random.normal(keys[ki], (dims[i],), jnp.float32); ki += 1
        wl = 0.5 * jax.random.normal(keys[ki], (dims[i - 1], 1), jnp.float32); ki += 1
        bl = 0.5 * jax.random.normal(keys[ki], (1,), jnp.float32); ki += 1
        layers.append((wnl, bnl, wl, bl))

    params = dict(
        in_slope=jax.random.normal(keys[ki], (n_holes,), jnp.float32),        # holes_in slope_params
        in_bias=jax.random.normal(keys[ki + 1], (n_holes,), jnp.float32),     # holes_in bias
        out_slope=jax.random.normal(keys[ki + 2], (n_holes, C), jnp.float32), # holes_out slope_params
        out_bias=jax.random.normal(keys[ki + 3], (n_holes, C), jnp.float32),  # holes_out bias
        positive_outs=jnp.array([0.0, 1.0], jnp.float32),                     # [False, True]
        out_monot=np.array([True, True]),                                     # monot='+'
        layers=layers,
    )

    xs = [jax.random.normal(keys[ki + 4 + i], (rows_per_hole[i], 1), jnp.float32)
          for i in range(n_holes)]

    outs = watercan_forward(xs, params)
    outs = [jax.block_until_ready(o) for o in outs]

    refs = watercan_reference(xs, params)
    for o, r in zip(outs, refs):
        assert o.shape == r.shape
        np.testing.assert_allclose(np.asarray(o), np.asarray(r), rtol=1e-5, atol=1e-5)

    print("KERNEL_OK")
</pallas_src>

<mosaic_0001>
module attributes {stable_mosaic.version = 11 : i64} {
  func.func @kernel(%arg0: i32, %arg1: memref<1x128xf32, #tpu.memory_space<vmem>>, %arg2: memref<1x128xi32, #tpu.memory_space<vmem>>, %arg3: memref<57xf32, #tpu.memory_space<smem>>, %arg4: memref<2x128xf32, #tpu.memory_space<vmem>>) attributes {dimension_semantics = [#tpu.dimension_semantics<parallel>], iteration_bounds = array<i64: 1>, scalar_prefetch = 0 : i64, scratch_operands = 0 : i64, tpu.core_type = #tpu.core_type<tc>, window_params = [{transform_indices = @transform_0, window_bounds = array<i64: 1, 128>}, {transform_indices = @transform_1, window_bounds = array<i64: 1, 128>}, {transform_indices = @transform_2, window_bounds = array<i64: 57>}, {transform_indices = @transform_3, window_bounds = array<i64: 2, 128>}]} {
    %c0 = arith.constant 0 : index
    %c0_0 = arith.constant 0 : index
    %0 = vector.load %arg1[%c0, %c0_0] : memref<1x128xf32, #tpu.memory_space<vmem>>, vector<1x128xf32>
    %c0_1 = arith.constant 0 : index
    %c0_2 = arith.constant 0 : index
    %1 = vector.load %arg2[%c0_1, %c0_2] : memref<1x128xi32, #tpu.memory_space<vmem>>, vector<1x128xi32>
    %c0_i32 = arith.constant 0 : i32
    %2 = vector.broadcast %c0_i32 : i32 to vector<1x128xi32>
    %3 = arith.cmpi eq, %1, %2 : vector<1x128xi32>
    %c1_i32 = arith.constant 1 : i32
    %4 = vector.broadcast %c1_i32 : i32 to vector<1x128xi32>
    %5 = arith.cmpi eq, %1, %4 : vector<1x128xi32>
    %cst = arith.constant 0.000000e+00 : f32
    %6 = vector.broadcast %cst : f32 to vector<1x128xf32>
    %cst_3 = arith.constant 0.000000e+00 : f32
    %7 = vector.broadcast %cst_3 : f32 to vector<1x128xf32>
    %c0_4 = arith.constant 0 : index
    %8 = memref.load %arg3[%c0_4] : memref<57xf32, #tpu.memory_space<smem>>
    %9 = vector.broadcast %8 : f32 to vector<1x128xf32>
    %10 = arith.select %3, %9, %6 : vector<1x128xi1>, vector<1x128xf32>
    %c2 = arith.constant 2 : index
    %11 = memref.load %arg3[%c2] : memref<57xf32, #tpu.memory_space<smem>>
    %12 = vector.broadcast %11 : f32 to vector<1x128xf32>
    %13 = arith.select %3, %12, %7 : vector<1x128xi1>, vector<1x128xf32>
    %c1 = arith.constant 1 : index
    %14 = memref.load %arg3[%c1] : memref<57xf32, #tpu.memory_space<smem>>
    %15 = vector.broadcast %14 : f32 to vector<1x128xf32>
    %16 = arith.select %5, %15, %10 : vector<1x128xi1>, vector<1x128xf32>
    %c3 = arith.constant 3 : index
    %17 = memref.load %arg3[%c3] : memref<57xf32, #tpu.memory_space<smem>>
    %18 = vector.broadcast %17 : f32 to vector<1x128xf32>
    %19 = arith.select %5, %18, %13 : vector<1x128xi1>, vector<1x128xf32>
    %20 = arith.mulf %0, %16 : vector<1x128xf32>
    %21 = arith.addf %20, %19 : vector<1x128xf32>
    %c12 = arith.constant 12 : index
    %22 = memref.load %arg3[%c12] : memref<57xf32, #tpu.memory_space<smem>>
    %23 = vector.broadcast %22 : f32 to vector<1x128xf32>
    %24 = arith.mulf %21, %23 : vector<1x128xf32>
    %c13 = arith.constant 13 : index
    %25 = memref.load %arg3[%c13] : memref<57xf32, #tpu.memory_space<smem>>
    %26 = vector.broadcast %25 : f32 to vector<1x128xf32>
    %27 = arith.addf %24, %26 : vector<1x128xf32>
    %c14 = arith.constant 14 : index
    %28 = memref.load %arg3[%c14] : memref<57xf32, #tpu.memory_space<smem>>
    %29 = vector.broadcast %28 : f32 to vector<1x128xf32>
    %30 = arith.mulf %21, %29 : vector<1x128xf32>
    %c22 = arith.constant 22 : index
    %31 = memref.load %arg3[%c22] : memref<57xf32, #tpu.memory_space<smem>>
    %32 = vector.broadcast %31 : f32 to vector<1x128xf32>
    %33 = arith.addf %30, %32 : vector<1x128xf32>
    %cst_5 = arith.constant 0.000000e+00 : f32
    %34 = vector.broadcast %cst_5 : f32 to vector<1x128xf32>
    %35 = arith.maximumf %33, %34 : vector<1x128xf32>
    %36 = math.absf %33 : vector<1x128xf32>
    %cst_6 = arith.constant 0.000000e+00 : f32
    %37 = vector.broadcast %cst_6 : f32 to vector<1x128xf32>
    %38 = arith.subf %37, %36 : vector<1x128xf32>
    %39 = math.exp %38 : vector<1x128xf32>
    %40 = math.log1p %39 : vector<1x128xf32>
    %41 = arith.addf %35, %40 : vector<1x128xf32>
    %42 = arith.addf %27, %41 : vector<1x128xf32>
    %c15 = arith.constant 15 : index
    %43 = memref.load %arg3[%c15] : memref<57xf32, #tpu.memory_space<smem>>
    %44 = vector.broadcast %43 : f32 to vector<1x128xf32>
    %45 = arith.mulf %21, %44 : vector<1x128xf32>
    %c23 = arith.constant 23 : index
    %46 = memref.load %arg3[%c23] : memref<57xf32, #tpu.memory_space<smem>>
    %47 = vector.broadcast %46 : f32 to vector<1x128xf32>
    %48 = arith.addf %45, %47 : vector<1x128xf32>
    %cst_7 = arith.constant 0.000000e+00 : f32
    %49 = vector.broadcast %cst_7 : f32 to vector<1x128xf32>
    %50 = arith.maximumf %48, %49 : vector<1x128xf32>
    %51 = math.absf %48 : vector<1x128xf32>
    %cst_8 = arith.constant 0.000000e+00 : f32
    %52 = vector.broadcast %cst_8 : f32 to vector<1x128xf32>
    %53 = arith.subf %52, %51 : vector<1x128xf32>
    %54 = math.exp %53 : vector<1x128xf32>
    %55 = math.log1p %54 : vector<1x128xf32>
    %56 = arith.addf %50, %55 : vector<1x128xf32>
    %57 = arith.addf %27, %56 : vector<1x128xf32>
    %c16 = arith.constant 16 : index
    %58 = memref.load %arg3[%c16] : memref<57xf32, #tpu.memory_space<smem>>
    %59 = vector.broadcast %58 : f32 to vector<1x128xf32>
    %60 = arith.mulf %21, %59 : vector<1x128xf32>
    %c24 = arith.constant 24 : index
    %61 = memref.load %arg3[%c24] : memref<57xf32, #tpu.memory_space<smem>>
    %62 = vector.broadcast %61 : f32 to vector<1x128xf32>
    %63 = arith.addf %60, %62 : vector<1x128xf32>
    %cst_9 = arith.constant 0.000000e+00 : f32
    %64 = vector.broadcast %cst_9 : f32 to vector<1x128xf32>
    %65 = arith.maximumf %63, %64 : vector<1x128xf32>
    %66 = math.absf %63 : vector<1x128xf32>
    %cst_10 = arith.constant 0.000000e+00 : f32
    %67 = vector.broadcast %cst_10 : f32 to vector<1x128xf32>
    %68 = arith.subf %67, %66 : vector<1x128xf32>
    %69 = math.exp %68 : vector<1x128xf32>
    %70 = math.log1p %69 : vector<1x128xf32>
    %71 = arith.addf %65, %70 : vector<1x128xf32>
    %72 = arith.addf %27, %71 : vector<1x128xf32>
    %c17 = arith.constant 17 : index
    %73 = memref.load %arg3[%c17] : memref<57xf32, #tpu.memory_space<smem>>
    %74 = vector.broadcast %73 : f32 to vector<1x128xf32>
    %75 = arith.mulf %21, %74 : vector<1x128xf32>
    %c25 = arith.constant 25 : index
    %76 = memref.load %arg3[%c25] : memref<57xf32, #tpu.memory_space<smem>>
    %77 = vector.broadcast %76 : f32 to vector<1x128xf32>
    %78 = arith.addf %75, %77 : vector<1x128xf32>
    %cst_11 = arith.constant 0.000000e+00 : f32
    %79 = vector.broadcast %cst_11 : f32 to vector<1x128xf32>
    %80 = arith.maximumf %78, %79 : vector<1x128xf32>
    %81 = math.absf %78 : vector<1x128xf32>
    %cst_12 = arith.constant 0.000000e+00 : f32
    %82 = vector.broadcast %cst_12 : f32 to vector<1x128xf32>
    %83 = arith.subf %82, %81 : vector<1x128xf32>
    %84 = math.exp %83 : vector<1x128xf32>
    %85 = math.log1p %84 : vector<1x128xf32>
    %86 = arith.addf %80, %85 : vector<1x128xf32>
    %87 = arith.addf %27, %86 : vector<1x128xf32>
    %c18 = arith.constant 18 : index
    %88 = memref.load %arg3[%c18] : memref<57xf32, #tpu.memory_space<smem>>
    %89 = vector.broadcast %88 : f32 to vector<1x128xf32>
    %90 = arith.mulf %21, %89 : vector<1x128xf32>
    %c26 = arith.constant 26 : index
    %91 = memref.load %arg3[%c26] : memref<57xf32, #tpu.memory_space<smem>>
    %92 = vector.broadcast %91 : f32 to vector<1x128xf32>
    %93 = arith.addf %90, %92 : vector<1x128xf32>
    %cst_13 = arith.constant 0.000000e+00 : f32
    %94 = vector.broadcast %cst_13 : f32 to vector<1x128xf32>
    %95 = arith.maximumf %93, %94 : vector<1x128xf32>
    %96 = math.absf %93 : vector<1x128xf32>
    %cst_14 = arith.constant 0.000000e+00 : f32
    %97 = vector.broadcast %cst_14 : f32 to vector<1x128xf32>
    %98 = arith.subf %97, %96 : vector<1x128xf32>
    %99 = math.exp %98 : vector<1x128xf32>
    %100 = math.log1p %99 : vector<1x128xf32>
    %101 = arith.addf %95, %100 : vector<1x128xf32>
    %102 = arith.addf %27, %101 : vector<1x128xf32>
    %c19 = arith.constant 19 : index
    %103 = memref.load %arg3[%c19] : memref<57xf32, #tpu.memory_space<smem>>
    %104 = vector.broadcast %103 : f32 to vector<1x128xf32>
    %105 = arith.mulf %21, %104 : vector<1x128xf32>
    %c27 = arith.constant 27 : index
    %106 = memref.load %arg3[%c27] : memref<57xf32, #tpu.memory_space<smem>>
    %107 = vector.broadcast %106 : f32 to vector<1x128xf32>
    %108 = arith.addf %105, %107 : vector<1x128xf32>
    %cst_15 = arith.constant 0.000000e+00 : f32
    %109 = vector.broadcast %cst_15 : f32 to vector<1x128xf32>
    %110 = arith.maximumf %108, %109 : vector<1x128xf32>
    %111 = math.absf %108 : vector<1x128xf32>
    %cst_16 = arith.constant 0.000000e+00 : f32
    %112 = vector.broadcast %cst_16 : f32 to vector<1x128xf32>
    %113 = arith.subf %112, %111 : vector<1x128xf32>
    %114 = math.exp %113 : vector<1x128xf32>
    %115 = math.log1p %114 : vector<1x128xf32>
    %116 = arith.addf %110, %115 : vector<1x128xf32>
    %117 = arith.addf %27, %116 : vector<1x128xf32>
    %c20 = arith.constant 20 : index
    %118 = memref.load %arg3[%c20] : memref<57xf32, #tpu.memory_space<smem>>
    %119 = vector.broadcast %118 : f32 to vector<1x128xf32>
    %120 = arith.mulf %21, %119 : vector<1x128xf32>
    %c28 = arith.constant 28 : index
    %121 = memref.load %arg3[%c28] : memref<57xf32, #tpu.memory_space<smem>>
    %122 = vector.broadcast %121 : f32 to vector<1x128xf32>
    %123 = arith.addf %120, %122 : vector<1x128xf32>
    %cst_17 = arith.constant 0.000000e+00 : f32
    %124 = vector.broadcast %cst_17 : f32 to vector<1x128xf32>
    %125 = arith.maximumf %123, %124 : vector<1x128xf32>
    %126 = math.absf %123 : vector<1x128xf32>
    %cst_18 = arith.constant 0.000000e+00 : f32
    %127 = vector.broadcast %cst_18 : f32 to vector<1x128xf32>
    %128 = arith.subf %127, %126 : vector<1x128xf32>
    %129 = math.exp %128 : vector<1x128xf32>
    %130 = math.log1p %129 : vector<1x128xf32>
    %131 = arith.addf %125, %130 : vector<1x128xf32>
    %132 = arith.addf %27, %131 : vector<1x128xf32>
    %c21 = arith.constant 21 : index
    %133 = memref.load %arg3[%c21] : memref<57xf32, #tpu.memory_space<smem>>
    %134 = vector.broadcast %133 : f32 to vector<1x128xf32>
    %135 = arith.mulf %21, %134 : vector<1x128xf32>
    %c29 = arith.constant 29 : index
    %136 = memref.load %arg3[%c29] : memref<57xf32, #tpu.memory_space<smem>>
    %137 = vector.broadcast %136 : f32 to vector<1x128xf32>
    %138 = arith.addf %135, %137 : vector<1x128xf32>
    %cst_19 = arith.constant 0.000000e+00 : f32
    %139 = vector.broadcast %cst_19 : f32 to vector<1x128xf32>
    %140 = arith.maximumf %138, %139 : vector<1x128xf32>
    %141 = math.absf %138 : vector<1x128xf32>
    %cst_20 = arith.constant 0.000000e+00 : f32
    %142 = vector.broadcast %cst_20 : f32 to vector<1x128xf32>
    %143 = arith.subf %142, %141 : vector<1x128xf32>
    %144 = math.exp %143 : vector<1x128xf32>
    %145 = math.log1p %144 : vector<1x128xf32>
    %146 = arith.addf %140, %145 : vector<1x128xf32>
    %147 = arith.addf %27, %146 : vector<1x128xf32>
    %148 = tpu.concatenate %42, %57, %72, %87, %102, %117, %132, %147 in 0 : vector<1x128xf32>, vector<1x128xf32>, vector<1x128xf32>, vector<1x128xf32>, vector<1x128xf32>, vector<1x128xf32>, vector<1x128xf32>, vector<1x128xf32> -> vector<8x128xf32>
    %149 = vector.extract_strided_slice %148 {offsets = [0, 0], sizes = [1, 128], strides = [1, 1]} : vector<8x128xf32> to vector<1x128xf32>
    %c30 = arith.constant 30 : index
    %150 = memref.load %arg3[%c30] : memref<57xf32, #tpu.memory_space<smem>>
    %151 = vector.broadcast %150 : f32 to vector<1x128xf32>
    %152 = arith.mulf %149, %151 : vector<1x128xf32>
    %153 = vector.extract_strided_slice %148 {offsets = [1, 0], sizes = [1, 128], strides = [1, 1]} : vector<8x128xf32> to vector<1x128xf32>
    %c31 = arith.constant 31 : index
    %154 = memref.load %arg3[%c31] : memref<57xf32, #tpu.memory_space<smem>>
    %155 = vector.broadcast %154 : f32 to vector<1x128xf32>
    %156 = arith.mulf %153, %155 : vector<1x128xf32>
    %157 = arith.addf %152, %156 : vector<1x128xf32>
    %158 = vector.extract_strided_slice %148 {offsets = [2, 0], sizes = [1, 128], strides = [1, 1]} : vector<8x128xf32> to vector<1x128xf32>
    %c32 = arith.constant 32 : index
    %159 = memref.load %arg3[%c32] : memref<57xf32, #tpu.memory_space<smem>>
    %160 = vector.broadcast %159 : f32 to vector<1x128xf32>
    %161 = arith.mulf %158, %160 : vector<1x128xf32>
    %162 = arith.addf %157, %161 : vector<1x128xf32>
    %163 = vector.extract_strided_slice %148 {offsets = [3, 0], sizes = [1, 128], strides = [1, 1]} : vector<8x128xf32> to vector<1x128xf32>
    %c33 = arith.constant 33 : index
    %164 = memref.load %arg3[%c33] : memref<57xf32, #tpu.memory_space<smem>>
    %165 = vector.broadcast %164 : f32 to vector<1x128xf32>
    %166 = arith.mulf %163, %165 : vector<1x128xf32>
    %167 = arith.addf %162, %166 : vector<1x128xf32>
    %168 = vector.extract_strided_slice %148 {offsets = [4, 0], sizes = [1, 128], strides = [1, 1]} : vector<8x128xf32> to vector<1x128xf32>
    %c34 = arith.constant 34 : index
    %169 = memref.load %arg3[%c34] : memref<57xf32, #tpu.memory_space<smem>>
    %170 = vector.broadcast %169 : f32 to vector<1x128xf32>
    %171 = arith.mulf %168, %170 : vector<1x128xf32>
    %172 = arith.addf %167, %171 : vector<1x128xf32>
    %173 = vector.extract_strided_slice %148 {offsets = [5, 0], sizes = [1, 128], strides = [1, 1]} : vector<8x128xf32> to vector<1x128xf32>
    %c35 = arith.constant 35 : index
    %174 = memref.load %arg3[%c35] : memref<57xf32, #tpu.memory_space<smem>>
    %175 = vector.broadcast %174 : f32 to vector<1x128xf32>
    %176 = arith.mulf %173, %175 : vector<1x128xf32>
    %177 = arith.addf %172, %176 : vector<1x128xf32>
    %178 = vector.extract_strided_slice %148 {offsets = [6, 0], sizes = [1, 128], strides = [1, 1]} : vector<8x128xf32> to vector<1x128xf32>
    %c36 = arith.constant 36 : index
    %179 = memref.load %arg3[%c36] : memref<57xf32, #tpu.memory_space<smem>>
    %180 = vector.broadcast %179 : f32 to vector<1x128xf32>
    %181 = arith.mulf %178, %180 : vector<1x128xf32>
    %182 = arith.addf %177, %181 : vector<1x128xf32>
    %183 = vector.extract_strided_slice %148 {offsets = [7, 0], sizes = [1, 128], strides = [1, 1]} : vector<8x128xf32> to vector<1x128xf32>
    %c37 = arith.constant 37 : index
    %184 = memref.load %arg3[%c37] : memref<57xf32, #tpu.memory_space<smem>>
    %185 = vector.broadcast %184 : f32 to vector<1x128xf32>
    %186 = arith.mulf %183, %185 : vector<1x128xf32>
    %187 = arith.addf %182, %186 : vector<1x128xf32>
    %c38 = arith.constant 38 : index
    %188 = memref.load %arg3[%c38] : memref<57xf32, #tpu.memory_space<smem>>
    %189 = vector.broadcast %188 : f32 to vector<1x128xf32>
    %190 = arith.addf %187, %189 : vector<1x128xf32>
    %191 = vector.extract_strided_slice %148 {offsets = [0, 0], sizes = [1, 128], strides = [1, 1]} : vector<8x128xf32> to vector<1x128xf32>
    %c39 = arith.constant 39 : index
    %192 = memref.load %arg3[%c39] : memref<57xf32, #tpu.memory_space<smem>>
    %193 = vector.broadcast %192 : f32 to vector<1x128xf32>
    %194 = arith.mulf %191, %193 : vector<1x128xf32>
    %195 = vector.extract_strided_slice %148 {offsets = [1, 0], sizes = [1, 128], strides = [1, 1]} : vector<8x128xf32> to vector<1x128xf32>
    %c41 = arith.constant 41 : index
    %196 = memref.load %arg3[%c41] : memref<57xf32, #tpu.memory_space<smem>>
    %197 = vector.broadcast %196 : f32 to vector<1x128xf32>
    %198 = arith.mulf %195, %197 : vector<1x128xf32>
    %199 = arith.addf %194, %198 : vector<1x128xf32>
    %200 = vector.extract_strided_slice %148 {offsets = [2, 0], sizes = [1, 128], strides = [1, 1]} : vector<8x128xf32> to vector<1x128xf32>
    %c43 = arith.constant 43 : index
    %201 = memref.load %arg3[%c43] : memref<57xf32, #tpu.memory_space<smem>>
    %202 = vector.broadcast %201 : f32 to vector<1x128xf32>
    %203 = arith.mulf %200, %202 : vector<1x128xf32>
    %204 = arith.addf %199, %203 : vector<1x128xf32>
    %205 = vector.extract_strided_slice %148 {offsets = [3, 0], sizes = [1, 128], strides = [1, 1]} : vector<8x128xf32> to vector<1x128xf32>
    %c45 = arith.constant 45 : index
    %206 = memref.load %arg3[%c45] : memref<57xf32, #tpu.memory_space<smem>>
    %207 = vector.broadcast %206 : f32 to vector<1x128xf32>
    %208 = arith.mulf %205, %207 : vector<1x128xf32>
    %209 = arith.addf %204, %208 : vector<1x128xf32>
    %210 = vector.extract_strided_slice %148 {offsets = [4, 0], sizes = [1, 128], strides = [1, 1]} : vector<8x128xf32> to vector<1x128xf32>
    %c47 = arith.constant 47 : index
    %211 = memref.load %arg3[%c47] : memref<57xf32, #tpu.memory_space<smem>>
    %212 = vector.broadcast %211 : f32 to vector<1x128xf32>
    %213 = arith.mulf %210, %212 : vector<1x128xf32>
    %214 = arith.addf %209, %213 : vector<1x128xf32>
    %215 = vector.extract_strided_slice %148 {offsets = [5, 0], sizes = [1, 128], strides = [1, 1]} : vector<8x128xf32> to vector<1x128xf32>
    %c49 = arith.constant 49 : index
    %216 = memref.load %arg3[%c49] : memref<57xf32, #tpu.memory_space<smem>>
    %217 = vector.broadcast %216 : f32 to vector<1x128xf32>
    %218 = arith.mulf %215, %217 : vector<1x128xf32>
    %219 = arith.addf %214, %218 : vector<1x128xf32>
    %220 = vector.extract_strided_slice %148 {offsets = [6, 0], sizes = [1, 128], strides = [1, 1]} : vector<8x128xf32> to vector<1x128xf32>
    %c51 = arith.constant 51 : index
    %221 = memref.load %arg3[%c51] : memref<57xf32, #tpu.memory_space<smem>>
    %222 = vector.broadcast %221 : f32 to vector<1x128xf32>
    %223 = arith.mulf %220, %222 : vector<1x128xf32>
    %224 = arith.addf %219, %223 : vector<1x128xf32>
    %225 = vector.extract_strided_slice %148 {offsets = [7, 0], sizes = [1, 128], strides = [1, 1]} : vector<8x128xf32> to vector<1x128xf32>
    %c53 = arith.constant 53 : index
    %226 = memref.load %arg3[%c53] : memref<57xf32, #tpu.memory_space<smem>>
    %227 = vector.broadcast %226 : f32 to vector<1x128xf32>
    %228 = arith.mulf %225, %227 : vector<1x128xf32>
    %229 = arith.addf %224, %228 : vector<1x128xf32>
    %c55 = arith.constant 55 : index
    %230 = memref.load %arg3[%c55] : memref<57xf32, #tpu.memory_space<smem>>
    %231 = vector.broadcast %230 : f32 to vector<1x128xf32>
    %232 = arith.addf %229, %231 : vector<1x128xf32>
    %cst_21 = arith.constant 0.000000e+00 : f32
    %233 = vector.broadcast %cst_21 : f32 to vector<1x128xf32>
    %234 = arith.maximumf %232, %233 : vector<1x128xf32>
    %235 = math.absf %232 : vector<1x128xf32>
    %cst_22 = arith.constant 0.000000e+00 : f32
    %236 = vector.broadcast %cst_22 : f32 to vector<1x128xf32>
    %237 = arith.subf %236, %235 : vector<1x128xf32>
    %238 = math.exp %237 : vector<1x128xf32>
    %239 = math.log1p %238 : vector<1x128xf32>
    %240 = arith.addf %234, %239 : vector<1x128xf32>
    %241 = arith.addf %190, %240 : vector<1x128xf32>
    %242 = vector.extract_strided_slice %148 {offsets = [0, 0], sizes = [1, 128], strides = [1, 1]} : vector<8x128xf32> to vector<1x128xf32>
    %c40 = arith.constant 40 : index
    %243 = memref.load %arg3[%c40] : memref<57xf32, #tpu.memory_space<smem>>
    %244 = vector.broadcast %243 : f32 to vector<1x128xf32>
    %245 = arith.mulf %242, %244 : vector<1x128xf32>
    %246 = vector.extract_strided_slice %148 {offsets = [1, 0], sizes = [1, 128], strides = [1, 1]} : vector<8x128xf32> to vector<1x128xf32>
    %c42 = arith.constant 42 : index
    %247 = memref.load %arg3[%c42] : memref<57xf32, #tpu.memory_space<smem>>
    %248 = vector.broadcast %247 : f32 to vector<1x128xf32>
    %249 = arith.mulf %246, %248 : vector<1x128xf32>
    %250 = arith.addf %245, %249 : vector<1x128xf32>
    %251 = vector.extract_strided_slice %148 {offsets = [2, 0], sizes = [1, 128], strides = [1, 1]} : vector<8x128xf32> to vector<1x128xf32>
    %c44 = arith.constant 44 : index
    %252 = memref.load %arg3[%c44] : memref<57xf32, #tpu.memory_space<smem>>
    %253 = vector.broadcast %252 : f32 to vector<1x128xf32>
    %254 = arith.mulf %251, %253 : vector<1x128xf32>
    %255 = arith.addf %250, %254 : vector<1x128xf32>
    %256 = vector.extract_strided_slice %148 {offsets = [3, 0], sizes = [1, 128], strides = [1, 1]} : vector<8x128xf32> to vector<1x128xf32>
    %c46 = arith.constant 46 : index
    %257 = memref.load %arg3[%c46] : memref<57xf32, #tpu.memory_space<smem>>
    %258 = vector.broadcast %257 : f32 to vector<1x128xf32>
    %259 = arith.mulf %256, %258 : vector<1x128xf32>
    %260 = arith.addf %255, %259 : vector<1x128xf32>
    %261 = vector.extract_strided_slice %148 {offsets = [4, 0], sizes = [1, 128], strides = [1, 1]} : vector<8x128xf32> to vector<1x128xf32>
    %c48 = arith.constant 48 : index
    %262 = memref.load %arg3[%c48] : memref<57xf32, #tpu.memory_space<smem>>
    %263 = vector.broadcast %262 : f32 to vector<1x128xf32>
    %264 = arith.mulf %261, %263 : vector<1x128xf32>
    %265 = arith.addf %260, %264 : vector<1x128xf32>
    %266 = vector.extract_strided_slice %148 {offsets = [5, 0], sizes = [1, 128], strides = [1, 1]} : vector<8x128xf32> to vector<1x128xf32>
    %c50 = arith.constant 50 : index
    %267 = memref.load %arg3[%c50] : memref<57xf32, #tpu.memory_space<smem>>
    %268 = vector.broadcast %267 : f32 to vector<1x128xf32>
    %269 = arith.mulf %266, %268 : vector<1x128xf32>
    %270 = arith.addf %265, %269 : vector<1x128xf32>
    %271 = vector.extract_strided_slice %148 {offsets = [6, 0], sizes = [1, 128], strides = [1, 1]} : vector<8x128xf32> to vector<1x128xf32>
    %c52 = arith.constant 52 : index
    %272 = memref.load %arg3[%c52] : memref<57xf32, #tpu.memory_space<smem>>
    %273 = vector.broadcast %272 : f32 to vector<1x128xf32>
    %274 = arith.mulf %271, %273 : vector<1x128xf32>
    %275 = arith.addf %270, %274 : vector<1x128xf32>
    %276 = vector.extract_strided_slice %148 {offsets = [7, 0], sizes = [1, 128], strides = [1, 1]} : vector<8x128xf32> to vector<1x128xf32>
    %c54 = arith.constant 54 : index
    %277 = memref.load %arg3[%c54] : memref<57xf32, #tpu.memory_space<smem>>
    %278 = vector.broadcast %277 : f32 to vector<1x128xf32>
    %279 = arith.mulf %276, %278 : vector<1x128xf32>
    %280 = arith.addf %275, %279 : vector<1x128xf32>
    %c56 = arith.constant 56 : index
    %281 = memref.load %arg3[%c56] : memref<57xf32, #tpu.memory_space<smem>>
    %282 = vector.broadcast %281 : f32 to vector<1x128xf32>
    %283 = arith.addf %280, %282 : vector<1x128xf32>
    %cst_23 = arith.constant 0.000000e+00 : f32
    %284 = vector.broadcast %cst_23 : f32 to vector<1x128xf32>
    %285 = arith.maximumf %283, %284 : vector<1x128xf32>
    %286 = math.absf %283 : vector<1x128xf32>
    %cst_24 = arith.constant 0.000000e+00 : f32
    %287 = vector.broadcast %cst_24 : f32 to vector<1x128xf32>
    %288 = arith.subf %287, %286 : vector<1x128xf32>
    %289 = math.exp %288 : vector<1x128xf32>
    %290 = math.log1p %289 : vector<1x128xf32>
    %291 = arith.addf %285, %290 : vector<1x128xf32>
    %292 = arith.addf %190, %291 : vector<1x128xf32>
    %293 = tpu.concatenate %241, %292 in 0 : vector<1x128xf32>, vector<1x128xf32> -> vector<2x128xf32>
    %cst_25 = arith.constant 0.000000e+00 : f32
    %294 = vector.broadcast %cst_25 : f32 to vector<1x128xf32>
    %cst_26 = arith.constant 0.000000e+00 : f32
    %295 = vector.broadcast %cst_26 : f32 to vector<1x128xf32>
    %c4 = arith.constant 4 : index
    %296 = memref.load %arg3[%c4] : memref<57xf32, #tpu.memory_space<smem>>
    %297 = vector.broadcast %296 : f32 to vector<1x128xf32>
    %298 = arith.select %3, %297, %294 : vector<1x128xi1>, vector<1x128xf32>
    %c8 = arith.constant 8 : index
    %299 = memref.load %arg3[%c8] : memref<57xf32, #tpu.memory_space<smem>>
    %300 = vector.broadcast %299 : f32 to vector<1x128xf32>
    %301 = arith.select %3, %300, %295 : vector<1x128xi1>, vector<1x128xf32>
    %c6 = arith.constant 6 : index
    %302 = memref.load %arg3[%c6] : memref<57xf32, #tpu.memory_space<smem>>
    %303 = vector.broadcast %302 : f32 to vector<1x128xf32>
    %304 = arith.select %5, %303, %298 : vector<1x128xi1>, vector<1x128xf32>
    %c10 = arith.constant 10 : index
    %305 = memref.load %arg3[%c10] : memref<57xf32, #tpu.memory_space<smem>>
    %306 = vector.broadcast %305 : f32 to vector<1x128xf32>
    %307 = arith.select %5, %306, %301 : vector<1x128xi1>, vector<1x128xf32>
    %308 = vector.extract_strided_slice %293 {offsets = [0, 0], sizes = [1, 128], strides = [1, 1]} : vector<2x128xf32> to vector<1x128xf32>
    %309 = arith.mulf %308, %304 : vector<1x128xf32>
    %310 = arith.addf %309, %307 : vector<1x128xf32>
    %cst_27 = arith.constant 0.000000e+00 : f32
    %311 = vector.broadcast %cst_27 : f32 to vector<1x128xf32>
    %cst_28 = arith.constant 0.000000e+00 : f32
    %312 = vector.broadcast %cst_28 : f32 to vector<1x128xf32>
    %c5 = arith.constant 5 : index
    %313 = memref.load %arg3[%c5] : memref<57xf32, #tpu.memory_space<smem>>
    %314 = vector.broadcast %313 : f32 to vector<1x128xf32>
    %315 = arith.select %3, %314, %311 : vector<1x128xi1>, vector<1x128xf32>
    %c9 = arith.constant 9 : index
    %316 = memref.load %arg3[%c9] : memref<57xf32, #tpu.memory_space<smem>>
    %317 = vector.broadcast %316 : f32 to vector<1x128xf32>
    %318 = arith.select %3, %317, %312 : vector<1x128xi1>, vector<1x128xf32>
    %c7 = arith.constant 7 : index
    %319 = memref.load %arg3[%c7] : memref<57xf32, #tpu.memory_space<smem>>
    %320 = vector.broadcast %319 : f32 to vector<1x128xf32>
    %321 = arith.select %5, %320, %315 : vector<1x128xi1>, vector<1x128xf32>
    %c11 = arith.constant 11 : index
    %322 = memref.load %arg3[%c11] : memref<57xf32, #tpu.memory_space<smem>>
    %323 = vector.broadcast %322 : f32 to vector<1x128xf32>
    %324 = arith.select %5, %323, %318 : vector<1x128xi1>, vector<1x128xf32>
    %325 = vector.extract_strided_slice %293 {offsets = [1, 0], sizes = [1, 128], strides = [1, 1]} : vector<2x128xf32> to vector<1x128xf32>
    %326 = arith.mulf %325, %321 : vector<1x128xf32>
    %327 = arith.addf %326, %324 : vector<1x128xf32>
    %cst_29 = arith.constant 0.000000e+00 : f32
    %328 = vector.broadcast %cst_29 : f32 to vector<1x128xf32>
    %329 = arith.maximumf %327, %328 : vector<1x128xf32>
    %330 = math.absf %327 : vector<1x128xf32>
    %cst_30 = arith.constant 0.000000e+00 : f32
    %331 = vector.broadcast %cst_30 : f32 to vector<1x128xf32>
    %332 = arith.subf %331, %330 : vector<1x128xf32>
    %333 = math.exp %332 : vector<1x128xf32>
    %334 = math.log1p %333 : vector<1x128xf32>
    %335 = arith.addf %329, %334 : vector<1x128xf32>
    %336 = tpu.concatenate %310, %335 in 0 : vector<1x128xf32>, vector<1x128xf32> -> vector<2x128xf32>
    %c0_31 = arith.constant 0 : index
    %c0_32 = arith.constant 0 : index
    %337 = vector.load %arg4[%c0_31, %c0_32] : memref<2x128xf32, #tpu.memory_space<vmem>>, vector<2x128xf32>
    tpu.vector_store %arg4[%c0_31, %c0_32], %336 {strides = array<i32>} : memref<2x128xf32, #tpu.memory_space<vmem>>, vector<2x128xf32>,
    return
  }
  func.func @transform_0(%arg0: i32) -> (i32, i32) {
    %c0_i32 = arith.constant 0 : i32
    %c0_i32_0 = arith.constant 0 : i32
    return %c0_i32, %arg0 : i32, i32
  }
  func.func @transform_1(%arg0: i32) -> (i32, i32) {
    %c0_i32 = arith.constant 0 : i32
    %c0_i32_0 = arith.constant 0 : i32
    return %c0_i32, %arg0 : i32, i32
  }
  func.func @transform_2(%arg0: i32) -> i32 {
    %c0_i32 = arith.constant 0 : i32
    %c0_i32_0 = arith.constant 0 : i32
    return %c0_i32 : i32
  }
  func.func @transform_3(%arg0: i32) -> (i32, i32) {
    %c0_i32 = arith.constant 0 : i32
    %c0_i32_0 = arith.constant 0 : i32
    return %c0_i32, %arg0 : i32, i32
  }
}

</mosaic_0001>

<bundles_post_ra>
// kernel: tpu_custom_call.1
= control target key start
LH: loop header
LB: loop body
LE: loop exit
PB: predicated region body
PF: predicated region fallthrough
CT: control target
= control target key end

     0   :  { %8 = vsyncpa [#allocation3], 0  ;;  %s1047_s0 = inlined_call_operand.hbm [shape: f32[1,128], index: 0, kind: input, shape index: {}]   ;;  %s1048_s1 = inlined_call_operand.hbm [shape: s32[1,128], index: 1, kind: input, shape index: {}]   ;;  %s1049_s2 = inlined_call_operand.vmem [shape: f32[57], index: 2, kind: input, shape index: {}]   ;;  %s1050_s3 = inlined_call_operand.hbm [shape: f32[2,128], index: 3, kind: output, shape index: {}]  }
   0x1   :  { %9 = vsyncpa [#allocation7], 0 }
   0x2   :  { %10 = vsyncpa [#allocation5], 0 }
   0x3   :  { %11 = vsyncpa [#allocation4], 0  ;;  %s17_s14 = sshll.u32 %s1047_s0, 4  ;;  %s758_s15 = smov [#allocation2]   ;;  %s18_s14 = int_to_ptr.hbm [resolvable:$true] %s17_s14 }
   0x4   :  { %s19_s16 = sshll.u32 %s758_s15, 4  ;;  %s28_s19 = sshll.u32 %s1048_s1, 4  ;;  %s20_s16 = int_to_ptr.vmem [resolvable:$true] %s19_s16  ;;  %s29_s19 = int_to_ptr.hbm [resolvable:$true] %s28_s19 }
   0x5   :  { %22 = dma.hbm_to_vmem [thread:$0]  %s18_s14, 16, %s20_s16, [#allocation3]  }
   0x6   :  { %s759_s20 = smov [#allocation6]   ;;  %s39_s24 = sshll.u32 %s1049_s2, 4  ;;  %s40_s24 = int_to_ptr.vmem [resolvable:$true] %s39_s24 }
   0x7   :  { %s30_s21 = sshll.u32 %s759_s20, 4  ;;  %s760_s0 = smov [#allocation8]   ;;  %s31_s21 = int_to_ptr.vmem [resolvable:$true] %s30_s21 }
   0x8   :  { %33 = dma.hbm_to_vmem [thread:$0]  %s29_s19, 16, %s31_s21, [#allocation7]  }
   0x9   :  { %42 = dma.vmem_to_smem %s40_s24, 16, %s760_s0, [#allocation5]  }
   0xa   :  { %750 = dma.done.wait [#allocation3], 16  }
   0xb   :  { %751 = vsyncadd [#allocation3], 4294967280 }
   0xc   :  { %752 = dma.done.wait [#allocation7], 16  }
   0xd   :  { %753 = vsyncadd [#allocation7], 4294967280 }
   0xe   :  { %754 = dma.done.wait [#allocation5], 16  }
   0xf   :  { %755 = vsyncadd [#allocation5], 4294967280 }
  0x10   :  { %55 = sfence }
  0x11   :  { %s60_s1 = sld [smem:[#allocation8]]  ;;  %v791_v0 = vld [vmem:[#allocation6] sm:$0x1]  ;;  %v56_v2 = vld [vmem:[#allocation2] sm:$0x1]  ;;  %vm277_vm8 = vcmask 1040384  }
  0x12   :  { %s562_s25 = sld [smem:[#allocation8 + $0x2]]  ;;  %vm58_vm0 = vcmp.eq.s32.totalorder %v791_v0, 0  ;;  %vm59_vm1 = vcmp.eq.s32.totalorder %v791_v0, 1  ;;  %vm279_vm9 = vcmask 1041408   ;;  %vm281_vm11 = vcmask 1042432  }
  0x13   :  { %s563_s26 = sld [smem:[#allocation8 + $0x1]]  ;;  %vm283_vm13 = vcmask 1043456   ;;  %vm285_vm14 = vcmask 1044480   ;;  %vm287_vm15 = vcmask 1045504  }
  0x14   :  { %s564_s27 = sld [smem:[#allocation8 + $0x3]] }
  0x15   :  { %s567_s2 = sld [smem:[#allocation8 + $0xe]] }
  0x16   :  { %s568_s28 = sld [smem:[#allocation8 + $0x16]] }
  0x17   :  { %v61_v1 = vstv %s60_s1  ;;  %s569_s29 = sld [smem:[#allocation8 + $0xf]] }
  0x18   :  { %v62_v3 = vsel %vm58_vm0, %v61_v1, 0.0  ;;  %v64_v4 = vstv %s562_s25  ;;  %s570_s30 = sld [smem:[#allocation8 + $0x17]] }
  0x19   :  { %v65_v5 = vsel %vm58_vm0, %v64_v4, 0.0  ;;  %v67_v6 = vstv %s563_s26  ;;  %s571_s4 = sld [smem:[#allocation8 + $0x10]] }
  0x1a   :  { %v68_v7 = vsel %vm59_vm1, %v67_v6, %v62_v3  ;;  %v70_v8 = vstv %s564_s27  ;;  %s572_s5 = sld [smem:[#allocation8 + $0x18]] }
  0x1b   :  { %v71_v9 = vsel %vm59_vm1, %v70_v8, %v65_v5  ;;  %v72_v10 = vmul.f32 %v68_v7, %v56_v2  ;;  %v81_v12 = vstv %s567_s2  ;;  %s573_s6 = sld [smem:[#allocation8 + $0x11]] }
  0x1c   :  { %v84_v13 = vstv %s568_s28  ;;  %s574_s7 = sld [smem:[#allocation8 + $0x19]] }
  0x1d   :  { %v803_v11 = vadd.f32 %v72_v10, %v71_v9  ;;  %v103_v15 = vstv %s569_s29  ;;  %s575_s8 = sld [smem:[#allocation8 + $0x12]] }
  0x1e   :  { %v106_v17 = vstv %s570_s30  ;;  %s576_s9 = sld [smem:[#allocation8 + $0x1a]] }
  0x1f   :  { %v82_v14 = vmul.f32 %v81_v12, %v803_v11  ;;  %v104_v16 = vmul.f32 %v103_v15, %v803_v11  ;;  %v125_v19 = vstv %s571_s4  ;;  %s577_s10 = sld [smem:[#allocation8 + $0x13]] }
  0x20   :  { %v126_v21 = vmul.f32 %v125_v19, %v803_v11  ;;  %v128_v22 = vstv %s572_s5  ;;  %s812_s11 = sld [smem:[#allocation8 + $0x1b]] }
  0x21   :  { %v807_v18 = vadd.f32 %v84_v13, %v82_v14  ;;  %v809_v20 = vadd.f32 %v106_v17, %v104_v16  ;;  %v147_v24 = vstv %s573_s6  ;;  %s579_s12 = sld [smem:[#allocation8 + $0x14]] }
  0x22   :  { %v816_v26 = vadd.f32 %v128_v22, %v126_v21  ;;  %v148_v27 = vmul.f32 %v147_v24, %v803_v11  ;;  %s819_s13 = sld [smem:[#allocation8 + $0x1c]]  ;;  %v150_v29 = vstv %s574_s7 }
  0x23   :  { %v87_v23 = vand.u32 2147483647, %v807_v18  ;;  %v109_v25 = vand.u32 2147483647, %v809_v20  ;;  %v169_v30 = vstv %s575_s8  ;;  %s821_s14 = sld [smem:[#allocation8 + $0x15]] }
  0x24   :  { %v131_v32 = vand.u32 2147483647, %v816_v26  ;;  %v824_v33 = vadd.f32 %v150_v29, %v148_v27  ;;  %v170_v35 = vmul.f32 %v169_v30, %v803_v11  ;;  %v172_v36 = vstv %s576_s9  ;;  %s832_s15 = sld [smem:[#allocation8 + $0x1d]] }
  0x25   :  { %v88_v28 = vsub.f32 0.0, %v87_v23  ;;  %v110_v31 = vsub.f32 0.0, %v109_v25  ;;  %v191_v37 = vstv %s577_s10  ;;  %s841_s16 = sld [smem:[#allocation8 + $0xc]]  ;;  %v108_v29 = vmax.f32 %v809_v20, 0.0 }
  0x26   :  { %v132_v39 = vsub.f32 0.0, %v131_v32  ;;  %v153_v40 = vand.u32 2147483647, %v824_v33  ;;  %v828_v41 = vadd.f32 %v172_v36, %v170_v35  ;;  %v192_v42 = vmul.f32 %v191_v37, %v803_v11  ;;  %s845_s17 = sld [smem:[#allocation8 + $0xd]] }
  0x27   :  { %v89_v34 = vmul.f32 1.442695, %v88_v28  ;;  %v111_v38 = vmul.f32 1.442695, %v110_v31  ;;  %v194_v43 = vstv %s812_s11  ;;  %v213_v46 = vstv %s579_s12  ;;  %s913_s18 = sld [smem:[#allocation8 + $0x1f]] }
  0x28   :  { %v133_v44 = vmul.f32 1.442695, %v132_v39  ;;  %v154_v45 = vsub.f32 0.0, %v153_v40  ;;  %v175_v47 = vand.u32 2147483647, %v828_v41  ;;  %v835_v48 = vadd.f32 %v194_v43, %v192_v42  ;;  %s915_s19 = sld [smem:[#allocation8 + $0x27]] }
  0x29   :  { %622 = vpow2.f32 %v89_v34  ;;  %v214_v49 = vmul.f32 %v213_v46, %v803_v11  ;;  %v216_v51 = vstv %s819_s13  ;;  %v235_v54 = vstv %s821_s14  ;;  %s917_s20 = sld [smem:[#allocation8 + $0x29]] }
  0x2a   :  { %624 = vpow2.f32 %v111_v38  ;;  %v155_v50 = vmul.f32 1.442695, %v154_v45  ;;  %v176_v52 = vsub.f32 0.0, %v175_v47  ;;  %v197_v53 = vand.u32 2147483647, %v835_v48  ;;  %s921_s21 = sld [smem:[#allocation8 + $0x2b]] }
  0x2b   :  { %626 = vpow2.f32 %v133_v44  ;;  %v843_v55 = vadd.f32 %v216_v51, %v214_v49  ;;  %v236_v61 = vmul.f32 %v235_v54, %v803_v11  ;;  %v238_v63 = vstv %s832_s15  ;;  %s923_s22 = sld [smem:[#allocation8 + $0x2d]] }
  0x2c   :  { %628 = vpow2.f32 %v155_v50  ;;  %v177_v57 = vmul.f32 1.442695, %v176_v52  ;;  %v198_v58 = vsub.f32 0.0, %v197_v53  ;;  %v75_v12 = vstv %s841_s16  ;;  %s925_s23 = sld [smem:[#allocation8 + $0x2f]] }
  0x2d   :  { %v219_v4 = vand.u32 2147483647, %v843_v55  ;;  %v850_v8 = vadd.f32 %v238_v63, %v236_v61  ;;  %v78_v16 = vstv %s845_s17  ;;  %v76_v28 = vmul.f32 %v75_v12, %v803_v11  ;;  %s928_s24 = sld [smem:[#allocation8 + $0x31]] }
  0x2e   :  { %630 = vpow2.f32 %v177_v57  ;;  %v199_v3 = vmul.f32 1.442695, %v198_v58  ;;  %v86_v54 = vmax.f32 %v807_v18, 0.0  ;;  %v218_v38 = vmax.f32 %v843_v55, 0.0  ;;  %s930_s0 = sld [smem:[#allocation8 + $0x33]] }
  0x2f   :  { %v623_v56 = vpop.eup %622  ;;  %v220_v14 = vsub.f32 0.0, %v219_v4  ;;  %v241_v25 = vand.u32 2147483647, %v850_v8  ;;  %v875_v53 = vadd.f32 %v78_v16, %v76_v28  ;;  %v152_v4 = vmax.f32 %v824_v33, 0.0  ;;  %s932_s1 = sld [smem:[#allocation8 + $0x35]] }
  0x30   :  { %v625_v59 = vpop.eup %624  ;;  %v91_v60 = vadd.f32 1.0, %v623_v56  ;;  %v94_v7 = vmul.f32 -0.5, %v623_v56  ;;  %v97_v17 = vand.u32 2147483647, %v623_v56  ;;  %v174_v33 = vmax.f32 %v828_v41, 0.0  ;;  %s935_s25 = sld [smem:[#allocation8 + $0x28]] }
  0x31   :  { %v113_v62 = vadd.f32 1.0, %v625_v59  ;;  %v627_v1 = vpop.eup %626  ;;  %v116_v2 = vmul.f32 -0.5, %v625_v59  ;;  %v119_v19 = vand.u32 2147483647, %v625_v59  ;;  %v221_v36 = vmul.f32 1.442695, %v220_v14 }
  0x32   :  { %632 = vlog2.f32 %v91_v60  ;;  %v135_v5 = vadd.f32 1.0, %v627_v1  ;;  %v629_v6 = vpop.eup %628  ;;  %v138_v9 = vmul.f32 -0.5, %v627_v1  ;;  %v95_v22 = vadd.f32 1.0, %v94_v7  ;;  %s937_s26 = sld [smem:[#allocation8 + $0x2a]] }
  0x33   :  { %634 = vlog2.f32 %v113_v62  ;;  %v157_v10 = vadd.f32 1.0, %v629_v6  ;;  %v117_v13 = vadd.f32 1.0, %v116_v2  ;;  %v160_v23 = vmul.f32 -0.5, %v629_v6  ;;  %s939_s27 = sld [smem:[#allocation8 + $0x2c]] }
  0x34   :  { %636 = vpow2.f32 %v199_v3  ;;  %v853_v15 = vpop.eup %630  ;;  %v139_v30 = vadd.f32 1.0, %v138_v9  ;;  %v141_v31 = vand.u32 2147483647, %v627_v1  ;;  %vm860_vm2 = vcmp.lt.f32.partialorder %v97_v17, 0.0004427343  ;;  %s941_s2 = sld [smem:[#allocation8 + $0x2e]] }
  0x35   :  { %638 = vlog2.f32 %v135_v5  ;;  %v179_v24 = vadd.f32 1.0, %v853_v15  ;;  %v118_v35 = vmul.f32 %v625_v59, %v117_v13  ;;  %vm864_vm3 = vcmp.lt.f32.partialorder %v119_v19, 0.0004427343  ;;  %s943_s28 = sld [smem:[#allocation8 + $0x30]] }
  0x36   :  { %640 = vlog2.f32 %v157_v10  ;;  %v182_v11 = vmul.f32 -0.5, %v853_v15  ;;  %v96_v20 = vmul.f32 %v623_v56, %v95_v22  ;;  %v161_v42 = vadd.f32 1.0, %v160_v23  ;;  %s949_s29 = sld [smem:[#allocation8 + $0x32]] }
  0x37   :  { %642 = vlog2.f32 %v179_v24  ;;  %v163_v43 = vand.u32 2147483647, %v629_v6  ;;  %v242_v44 = vsub.f32 0.0, %v241_v25  ;;  %v140_v49 = vmul.f32 %v627_v1, %v139_v30  ;;  %s955_s30 = sld [smem:[#allocation8 + $0x34]] }
  0x38   :  { %v633_v21 = vpop.eup %632  ;;  %vm871_vm4 = vcmp.lt.f32.partialorder %v141_v31, 0.0004427343  ;;  %v130_v56 = vmax.f32 %v816_v26, 0.0  ;;  %v183_v57 = vadd.f32 1.0, %v182_v11  ;;  %v162_v60 = vmul.f32 %v629_v6, %v161_v42  ;;  %s965_s4 = sld [smem:[#allocation8 + $0x36]] }
  0x39   :  { %v635_v27 = vpop.eup %634  ;;  %v93_v46 = vmul.f32 0.6931472, %v633_v21  ;;  %v185_v61 = vand.u32 2147483647, %v853_v15  ;;  %v243_v62 = vmul.f32 1.442695, %v242_v44  ;;  %v295_v24 = vstv %s913_s18 }
  0x3a   :  { %v637_v32 = vpop.eup %636  ;;  %v115_v34 = vmul.f32 0.6931472, %v635_v27  ;;  %vm884_vm5 = vcmp.lt.f32.partialorder %v163_v43, 0.0004427343  ;;  %v184_v6 = vmul.f32 %v853_v15, %v183_v57  ;;  %s967_s5 = sld [smem:[#allocation8 + $0x1e]] }
  0x3b   :  { %v639_v37 = vpop.eup %638  ;;  %v201_v40 = vadd.f32 1.0, %v637_v32  ;;  %v204_v52 = vmul.f32 -0.5, %v637_v32  ;;  %v99_v63 = vsel %vm860_vm2, %v96_v20, %v93_v46  ;;  %v207_v7 = vand.u32 2147483647, %v637_v32  ;;  %s972_s6 = sld [smem:[#allocation8 + $0x20]] }
  0x3c   :  { %v641_v45 = vpop.eup %640  ;;  %v137_v47 = vmul.f32 0.6931472, %v639_v37  ;;  %v121_v50 = vsel %vm864_vm3, %v118_v35, %v115_v34  ;;  %v100_v10 = vadd.f32 %v99_v63, %v86_v54  ;;  %vm892_vm6 = vcmp.lt.f32.partialorder %v185_v61, 0.0004427343  ;;  %s985_s7 = sld [smem:[#allocation8 + $0x37]] }
  0x3d   :  { %644 = vlog2.f32 %v201_v40  ;;  %v643_v58 = vpop.eup %642  ;;  %v159_v59 = vmul.f32 0.6931472, %v641_v45  ;;  %v122_v1 = vadd.f32 %v121_v50, %v108_v29  ;;  %v205_v18 = vadd.f32 1.0, %v204_v52  ;;  %s988_s8 = sld [smem:[#allocation8 + $0x21]] }
  0x3e   :  { %646 = vpow2.f32 %v221_v36  ;;  %v143_v2 = vsel %vm871_vm4, %v140_v49, %v137_v47  ;;  %v181_v5 = vmul.f32 0.6931472, %v643_v58  ;;  %vm900_vm7 = vcmp.lt.f32.partialorder %v207_v7, 0.0004427343  ;;  %s609_s9 = sld [smem:[#allocation8 + $0x38]] }
  0x3f   :  { %648 = vpow2.f32 %v243_v62  ;;  %v144_v12 = vadd.f32 %v143_v2, %v130_v56  ;;  %v165_v13 = vsel %vm884_vm5, %v162_v60, %v159_v59  ;;  %v123_v16 = vadd.f32 %v122_v1, %v875_v53  ;;  %s996_s10 = sld [smem:[#allocation8 + $0x22]] }
  0x40   :  { %v206_v22 = vmul.f32 %v637_v32, %v205_v18  ;;  %v166_v15 = vadd.f32 %v165_v13, %v152_v4  ;;  %v187_v23 = vsel %vm892_vm6, %v184_v6, %v181_v5  ;;  %v101_v27 = vadd.f32 %v100_v10, %v875_v53  ;;  %s588_s11 = sld [smem:[#allocation8 + $0x23]] }
  0x41   :  { %v145_v28 = vadd.f32 %v144_v12, %v875_v53  ;;  %v196_v29 = vmax.f32 %v835_v48, 0.0  ;;  %v257_v34 = vperm.slane %v123_v16, 0  ;;  %v188_v35 = vadd.f32 %v187_v23, %v174_v33  ;;  %s589_s12 = sld [smem:[#allocation8 + $0x24]] }
  0x42   :  { %v167_v37 = vadd.f32 %v166_v15, %v875_v53  ;;  %v240_v54 = vmax.f32 %v850_v8, 0.0  ;;  %vm289_vm2 = vcmask 1046528   ;;  %v357_v4 = vstv %s921_s21  ;;  %s590_s13 = sld [smem:[#allocation8 + $0x25]] }
  0x43   :  { %v645_v26 = vpop.eup %644  ;;  %v260_v40 = vperm.slane %v145_v28, 0  ;;  %v278_v43 = vsel %vm277_vm8, %v101_v27, %v257_v34  ;;  %v189_v44 = vadd.f32 %v188_v35, %v875_v53  ;;  %v364_v5 = vstv %s923_s22  ;;  %s614_s14 = sld [smem:[#allocation8 + $0x5]] }
  0x44   :  { %v647_v9 = vpop.eup %646  ;;  %v203_v21 = vmul.f32 0.6931472, %v645_v26  ;;  %v263_v46 = vperm.slane %v167_v37, 0  ;;  %v350_v26 = vstv %s917_s20  ;;  %v371_v7 = vstv %s925_s23  ;;  %s1015_s15 = sld [smem:[#allocation8 + $0x26]]  ;;  %s761_s23 = smov [#allocation9]  }
  0x45   :  { %v223_v17 = vadd.f32 1.0, %v647_v9  ;;  %v226_v19 = vmul.f32 -0.5, %v647_v9  ;;  %v649_v25 = vpop.eup %648  ;;  %v229_v41 = vand.u32 2147483647, %v647_v9  ;;  %v280_v49 = vsel %vm279_vm9, %v278_v43, %v260_v40  ;;  %s615_s16 = sld [smem:[#allocation8 + $0x9]] }
  0x46   :  { %v245_v31 = vadd.f32 1.0, %v649_v25  ;;  %v248_v32 = vmul.f32 -0.5, %v649_v25  ;;  %v209_v36 = vsel %vm900_vm7, %v206_v22, %v203_v21  ;;  %v251_v42 = vand.u32 2147483647, %v649_v25  ;;  %s616_s17 = sld [smem:[#allocation8 + $0x7]] }
  0x47   :  { %650 = vlog2.f32 %v223_v17  ;;  %v227_v30 = vadd.f32 1.0, %v226_v19  ;;  %v210_v20 = vadd.f32 %v209_v36, %v196_v29  ;;  %vm230_vm10 = vcmp.lt.f32.partialorder %v229_v41, 0.0004427343  ;;  %s617_s18 = sld [smem:[#allocation8 + $0xb]] }
  0x48   :  { %652 = vlog2.f32 %v245_v31  ;;  %v249_v11 = vadd.f32 1.0, %v248_v32  ;;  %vm252_vm12 = vcmp.lt.f32.partialorder %v251_v42, 0.0004427343  ;;  %v266_v57 = vperm.slane %v189_v44, 0  ;;  %s612_s20 = sld [smem:[#allocation8 + $0x6]] }
  0x49   :  { %v228_v39 = vmul.f32 %v647_v9, %v227_v30  ;;  %v211_v51 = vadd.f32 %v210_v20, %v875_v53  ;;  %v282_v58 = vsel %vm281_vm11, %v280_v49, %v263_v46  ;;  %v378_v9 = vstv %s928_s24  ;;  %s611_s21 = sld [smem:[#allocation8 + $0x8]]  ;;  %s548_s24 = sshll.u32 %s761_s23, 4  ;;  %s549_s24 = int_to_ptr.vmem [resolvable:$true] %s548_s24 }
  0x4a   :  { %v250_v47 = vmul.f32 %v649_v25, %v249_v11  ;;  %v284_v8 = vsel %vm283_vm13, %v282_v58, %v266_v57  ;;  %v385_v16 = vstv %s930_s0  ;;  %v418_v17 = vstv %s935_s25  ;;  %s613_s22 = sld [smem:[#allocation8 + $0xa]]  ;;  %s550_s25 = sshll.u32 %s1050_s3, 4  ;;  %s551_s25 = int_to_ptr.hbm [resolvable:$true] %s550_s25 }
  0x4b   :  { %v269_v62 = vperm.slane %v211_v51, 0  ;;  %v421_v19 = vstv %s937_s26  ;;  %v428_v33 = vstv %s939_s27  ;;  %v435_v23 = vstv %s941_s2 }
  0x4c   :  { %v392_v27 = vstv %s932_s1  ;;  %v442_v28 = vstv %s943_s28  ;;  %v449_v36 = vstv %s949_s29  ;;  %v456_v42 = vstv %s955_s30 }
  0x4d   :  { %v651_v48 = vpop.eup %650  ;;  %v286_v2 = vsel %vm285_vm14, %v284_v8, %v269_v62  ;;  %v302_v57 = vstv %s972_s6 }
  0x4e   :  { %v225_v45 = vmul.f32 0.6931472, %v651_v48  ;;  %v653_v50 = vpop.eup %652 }
  0x4f   :  { %v247_v56 = vmul.f32 0.6931472, %v653_v50 }
  0x50   :  { %v231_v55 = vsel %vm230_vm10, %v228_v39, %v225_v45 }
  0x51   :  { %v232_v52 = vadd.f32 %v231_v55, %v218_v38  ;;  %v253_v60 = vsel %vm252_vm12, %v250_v47, %v247_v56  ;;  %v463_v47 = vstv %s965_s4 }
  0x52   :  { %v254_v61 = vadd.f32 %v253_v60, %v240_v54  ;;  %v292_v54 = vstv %s967_s5 }
  0x53   :  { %v233_v59 = vadd.f32 %v232_v52, %v875_v53 }
  0x54   :  { %v255_v63 = vadd.f32 %v254_v61, %v875_v53  ;;  %v347_v53 = vstv %s915_s19  ;;  %s610_s19 = sld [smem:[#allocation8 + $0x4]] }
  0x55   :  { %v272_v1 = vperm.slane %v233_v59, 0 }
  0x56   :  { %v275_v3 = vperm.slane %v255_v63, 0 }
  0x57   :  { %v288_v18 = vsel %vm287_vm15, %v286_v2, %v272_v1 }
  0x58   :  { %v951_v6 = vsel %vm289_vm2, %v288_v18, %v275_v3 }
  0x59   :  { %v348_v10 = vmul.f32 %v347_v53, %v951_v6  ;;  %v351_v12 = vmul.f32 %v350_v26, %v951_v6  ;;  %v358_v13 = vmul.f32 %v357_v4, %v951_v6  ;;  %v365_v14 = vmul.f32 %v364_v5, %v951_v6 }
  0x5a   :  { %v372_v15 = vmul.f32 %v371_v7, %v951_v6  ;;  %v379_v25 = vmul.f32 %v378_v9, %v951_v6  ;;  %v419_v41 = vmul.f32 %v418_v17, %v951_v6  ;;  %v422_v31 = vmul.f32 %v421_v19, %v951_v6 }
  0x5b   :  { %v353_v21 = vrot.slane %v351_v12, 1  ;;  %v360_v22 = vrot.slane %v358_v13, 2  ;;  %v367_v30 = vrot.slane %v365_v14, 3  ;;  %v386_v32 = vmul.f32 %v385_v16, %v951_v6 }
  0x5c   :  { %v429_v34 = vmul.f32 %v428_v33, %v951_v6  ;;  %v436_v35 = vmul.f32 %v435_v23, %v951_v6  ;;  %v374_v38 = vrot.slane %v372_v15, 4  ;;  %v424_v39 = vrot.slane %v422_v31, 1 }
  0x5d   :  { %v355_v29 = vadd.f32 %v353_v21, %v348_v10  ;;  %v443_v11 = vmul.f32 %v442_v28, %v951_v6  ;;  %v381_v40 = vrot.slane %v379_v25, 5  ;;  %v393_v48 = vmul.f32 %v392_v27, %v951_v6 }
  0x5e   :  { %v431_v20 = vrot.slane %v429_v34, 2  ;;  %v426_v44 = vadd.f32 %v424_v39, %v419_v41  ;;  %v438_v45 = vrot.slane %v436_v35, 3  ;;  %v450_v46 = vmul.f32 %v449_v36, %v951_v6 }
  0x5f   :  { %v362_v37 = vadd.f32 %v360_v22, %v355_v29  ;;  %v388_v55 = vrot.slane %v386_v32, 6  ;;  %v445_v51 = vrot.slane %v443_v11, 4  ;;  %v457_v52 = vmul.f32 %v456_v42, %v951_v6 }
  0x60   :  { %v433_v50 = vadd.f32 %v431_v20, %v426_v44  ;;  %v296_v56 = vmul.f32 %v295_v24, %v951_v6  ;;  %v395_v58 = vrot.slane %v393_v48, 7  ;;  %v452_v61 = vrot.slane %v450_v46, 5 }
  0x61   :  { %v369_v43 = vadd.f32 %v367_v30, %v362_v37  ;;  %v464_v62 = vmul.f32 %v463_v47, %v951_v6  ;;  %v459_v1 = vrot.slane %v457_v52, 6  ;;  %v293_v2 = vmul.f32 %v292_v54, %v951_v6 }
  0x62   :  { %v440_v60 = vadd.f32 %v438_v45, %v433_v50  ;;  %v298_v3 = vrot.slane %v296_v56, 1  ;;  %v303_v18 = vmul.f32 %v302_v57, %v951_v6  ;;  %v399_v53 = vstv %s985_s7 }
  0x63   :  { %v376_v49 = vadd.f32 %v374_v38, %v369_v43  ;;  %v309_v26 = vstv %s988_s8  ;;  %v466_v7 = vrot.slane %v464_v62, 7  ;;  %v470_v16 = vstv %s609_s9 }
  0x64   :  { %v447_v63 = vadd.f32 %v445_v51, %v440_v60  ;;  %v300_v12 = vadd.f32 %v298_v3, %v293_v2  ;;  %v305_v13 = vrot.slane %v303_v18, 2  ;;  %v310_v14 = vmul.f32 %v309_v26, %v951_v6 }
  0x65   :  { %v383_v59 = vadd.f32 %v381_v40, %v376_v49  ;;  %v316_v17 = vstv %s996_s10  ;;  %v323_v25 = vstv %s588_s11  ;;  %v330_v32 = vstv %s589_s12 }
  0x66   :  { %v454_v5 = vadd.f32 %v452_v61, %v447_v63  ;;  %v307_v15 = vadd.f32 %v305_v13, %v300_v12  ;;  %v312_v23 = vrot.slane %v310_v14, 3  ;;  %v317_v24 = vmul.f32 %v316_v17, %v951_v6 }
  0x67   :  { %v390_v8 = vadd.f32 %v388_v55, %v383_v59  ;;  %v324_v31 = vmul.f32 %v323_v25, %v951_v6  ;;  %v331_v37 = vmul.f32 %v330_v32, %v951_v6  ;;  %v337_v39 = vstv %s590_s13 }
  0x68   :  { %v461_v10 = vadd.f32 %v459_v1, %v454_v5  ;;  %v314_v30 = vadd.f32 %v312_v23, %v307_v15  ;;  %v319_v41 = vrot.slane %v317_v24, 4  ;;  %v338_v42 = vmul.f32 %v337_v39, %v951_v6 }
  0x69   :  { %v397_v4 = vadd.f32 %v395_v58, %v390_v8  ;;  %v326_v36 = vrot.slane %v324_v31, 5  ;;  %v333_v20 = vrot.slane %v331_v37, 6  ;;  %v507_v59 = vstv %s614_s14 }
  0x6a   :  { %v468_v33 = vadd.f32 %v466_v7, %v461_v10  ;;  %v321_v35 = vadd.f32 %v319_v41, %v314_v30  ;;  %v340_v49 = vrot.slane %v338_v42, 7  ;;  %v344_v60 = vstv %s1015_s15 }
  0x6b   :  { %v1003_v9 = vadd.f32 %v399_v53, %v397_v4  ;;  %v510_v1 = vstv %s615_s16  ;;  %v508_v3 = vsel %vm58_vm0, %v507_v59, 0.0  ;;  %v513_v18 = vstv %s616_s17 }
  0x6c   :  { %v1008_v22 = vadd.f32 %v470_v16, %v468_v33  ;;  %v328_v48 = vadd.f32 %v326_v36, %v321_v35  ;;  %v511_v5 = vsel %vm58_vm0, %v510_v1, 0.0  ;;  %v516_v7 = vstv %s617_s18 }
  0x6d   :  { %v402_v19 = vand.u32 2147483647, %v1003_v9  ;;  %v401_v58 = vmax.f32 %v1003_v9, 0.0  ;;  %v514_v10 = vsel %vm59_vm1, %v513_v18, %v508_v3  ;;  %v517_v14 = vsel %vm59_vm1, %v516_v7, %v511_v5 }
  0x6e   :  { %v473_v28 = vand.u32 2147483647, %v1008_v22  ;;  %v335_v47 = vadd.f32 %v333_v20, %v328_v48  ;;  %v472_v63 = vmax.f32 %v1008_v22, 0.0  ;;  %v519_v16 = vperm.slane %v514_v10, 0 }
  0x6f   :  { %v403_v21 = vsub.f32 0.0, %v402_v19  ;;  %v523_v19 = vperm.slane %v517_v14, 0  ;;  %v493_v25 = vstv %s610_s19  ;;  %v496_v31 = vstv %s611_s21 }
  0x70   :  { %v474_v29 = vsub.f32 0.0, %v473_v28  ;;  %v342_v57 = vadd.f32 %v340_v49, %v335_v47  ;;  %v494_v28 = vsel %vm58_vm0, %v493_v25, 0.0  ;;  %v497_v35 = vsel %vm58_vm0, %v496_v31, 0.0 }
  0x71   :  { %v404_v27 = vmul.f32 1.442695, %v403_v21  ;;  %v502_v36 = vstv %s613_s22 }
  0x72   :  { %v475_v34 = vmul.f32 1.442695, %v474_v29  ;;  %v345_v53 = vadd.f32 %v344_v60, %v342_v57  ;;  %v499_v29 = vstv %s612_s20  ;;  %v503_v39 = vsel %vm59_vm1, %v502_v36, %v497_v35 }
  0x73   :  { %654 = vpow2.f32 %v404_v27  ;;  %v500_v32 = vsel %vm59_vm1, %v499_v29, %v494_v28 }
  0x74   :  { %656 = vpow2.f32 %v475_v34 }
  0x79   :  { %v655_v38 = vpop.eup %654 }
  0x7a   :  { %v406_v11 = vadd.f32 1.0, %v655_v38  ;;  %v409_v40 = vmul.f32 -0.5, %v655_v38  ;;  %v657_v43 = vpop.eup %656  ;;  %v412_v45 = vand.u32 2147483647, %v655_v38 }
  0x7b   :  { %v477_v46 = vadd.f32 1.0, %v657_v43  ;;  %v480_v55 = vmul.f32 -0.5, %v657_v43  ;;  %v483_v54 = vand.u32 2147483647, %v657_v43 }
  0x7c   :  { %658 = vlog2.f32 %v406_v11  ;;  %v410_v44 = vadd.f32 1.0, %v409_v40  ;;  %vm1017_vm3 = vcmp.lt.f32.partialorder %v412_v45, 0.0004427343 }
  0x7d   :  { %660 = vlog2.f32 %v477_v46  ;;  %v481_v51 = vadd.f32 1.0, %v480_v55  ;;  %vm484_vm4 = vcmp.lt.f32.partialorder %v483_v54, 0.0004427343 }
  0x7e   :  { %v411_v50 = vmul.f32 %v655_v38, %v410_v44 }
  0x7f   :  { %v482_v62 = vmul.f32 %v657_v43, %v481_v51 }
  0x82   :  { %v659_v52 = vpop.eup %658 }
  0x83   :  { %v408_v56 = vmul.f32 0.6931472, %v659_v52  ;;  %v661_v8 = vpop.eup %660 }
  0x84   :  { %v479_v2 = vmul.f32 0.6931472, %v661_v8 }
  0x85   :  { %v414_v61 = vsel %vm1017_vm3, %v411_v50, %v408_v56 }
  0x86   :  { %v415_v26 = vadd.f32 %v414_v61, %v401_v58  ;;  %v485_v4 = vsel %vm484_vm4, %v482_v62, %v479_v2 }
  0x87   :  { %v486_v9 = vadd.f32 %v485_v4, %v472_v63 }
  0x88   :  { %v416_v12 = vadd.f32 %v415_v26, %v345_v53 }
  0x89   :  { %v487_v13 = vadd.f32 %v486_v9, %v345_v53 }
  0x8b   :  { %v489_v17 = vrot.slane %v487_v13, 7 }
  0x8d   :  { %v491_v33 = vsel %vm277_vm8, %v416_v12, %v489_v17 }
  0x8e   :  { %v521_v21 = vmul.f32 %v519_v16, %v491_v33  ;;  %v504_v38 = vmul.f32 %v500_v32, %v491_v33 }
  0x90   :  { %v525_v22 = vadd.f32 %v523_v19, %v521_v21  ;;  %v505_v42 = vadd.f32 %v504_v38, %v503_v39 }
  0x92   :  { %v527_v15 = vand.u32 2147483647, %v525_v22  ;;  %v526_v48 = vmax.f32 %v525_v22, 0.0 }
  0x94   :  { %v528_v23 = vsub.f32 0.0, %v527_v15 }
  0x96   :  { %v529_v24 = vmul.f32 1.442695, %v528_v23 }
  0x98   :  { %662 = vpow2.f32 %v529_v24 }
  0x9e   :  { %v663_v27 = vpop.eup %662 }
  0x9f   :  { %v531_v30 = vadd.f32 1.0, %v663_v27  ;;  %v534_v41 = vmul.f32 -0.5, %v663_v27  ;;  %v537_v37 = vand.u32 2147483647, %v663_v27 }
  0xa1   :  { %664 = vlog2.f32 %v531_v30  ;;  %v535_v34 = vadd.f32 1.0, %v534_v41  ;;  %vm538_vm5 = vcmp.lt.f32.partialorder %v537_v37, 0.0004427343 }
  0xa3   :  { %v536_v11 = vmul.f32 %v663_v27, %v535_v34 }
  0xa7   :  { %v665_v40 = vpop.eup %664 }
  0xa8   :  { %v533_v20 = vmul.f32 0.6931472, %v665_v40 }
  0xaa   :  { %v539_v43 = vsel %vm538_vm5, %v536_v11, %v533_v20 }
  0xab   :  { %v540_v44 = vadd.f32 %v539_v43, %v526_v48 }
  0xad   :  { %v541_v45 = vsel %vm277_vm8, %v505_v42, %v540_v44 }
  0xae   :  { %542 = vst [vmem:[#allocation9] sm:$0x3] %v541_v45 }
  0xaf   :  { %553 = dma.vmem_to_hbm [thread:$0]  %s549_s24, 32, %s551_s25, [#allocation4]  }
  0xb0   :  { %756 = dma.done.wait [#allocation4], 32  }
  0xb1   :  { %757 = vsyncadd [#allocation4], 4294967264 }
  0xb2   :  { %558 = vsyncpa [#allocation3], 1 }
  0xb3   :  { %559 = vsyncpa [#allocation7], 1 }
  0xb4   :  { %560 = vsyncpa [#allocation4], 1 }
  0xb5   :  { %561 = vsyncpa [#allocation5], 1 }

</bundles_post_ra>
